<compile_context>
chip_gen: v7x
topology: tpu7x:2x2x1
jax: 0.10.0
libtpu: 0.0.40
codegen_flags: <defaults>
</compile_context>

<pallas_src>
import functools

import jax
import jax.numpy as jnp
from jax import lax
from jax.experimental import pallas as pl
from jax.experimental.pallas import tpu as pltpu


def _residual_to_plain_kernel(x_mm_ref, w_ref, b_ref, x_res_ref, o_ref, acc_ref):
    # x_mm_ref : (tm, tk)  -- x panel for the matmul (indexed by k)
    # w_ref    : (tn, tk)  -- weight panel in PyTorch [out, in] layout
    # b_ref    : (1, tn)   -- bias slice
    # x_res_ref: (tm, tn)  -- x panel aligned with the output tile (indexed by j)
    # o_ref    : (tm, tn)
    # acc_ref  : (tm, tn) f32 scratch accumulator
    k = pl.program_id(2)

    @pl.when(k == 0)
    def _():
        acc_ref[...] = jnp.zeros_like(acc_ref)

    # out[m, n] += sum_k x[m, k] * W[n, k]   (== x @ W^T), f32 accumulation.
    acc_ref[...] += lax.dot_general(
        x_mm_ref[...],
        w_ref[...],
        dimension_numbers=(((1,), (1,)), ((), ())),
        preferred_element_type=jnp.float32,
    )

    @pl.when(k == pl.num_programs(2) - 1)
    def _():
        res = acc_ref[...] + b_ref[...].astype(jnp.float32) \
              - x_res_ref[...].astype(jnp.float32)
        o_ref[...] = res.astype(o_ref.dtype)


def _round_up(x: int, m: int) -> int:
    return ((x + m - 1) // m) * m


@functools.partial(jax.jit, static_argnames=("tm", "tn", "tk"))
def residual_to_plain(x, weight, bias, *, tm: int = 256, tn: int = 256, tk: int = 256):
    """Fused Linear(x) - x.

    x:      [B, S, H]
    weight: [H_out, H_in] (PyTorch convention), must be square (H, H)
    bias:   [H]
    """
    B, S, H = x.shape
    assert weight.shape[0] == weight.shape[1] == H, (
        "ResidualToPlain requires a square (H, H) Linear for 'y - x'"
    )
    assert bias.shape == (H,)

    M = B * S
    x2d = x.reshape(M, H)

    LANE = 128
    # Clamp tiles to (padded) problem size; keep them hardware-aligned.
    tn = _round_up(min(tn, _round_up(H, LANE)), LANE)
    tk = _round_up(min(tk, _round_up(H, LANE)), LANE)
    assert max(tn, tk) % min(tn, tk) == 0, "tn/tk must nest"
    Hp = _round_up(H, max(tn, tk))

    tm = _round_up(min(tm, _round_up(M, 8)), 8)
    Mp = _round_up(M, tm)

    # Pad to tile multiples (zero padding keeps the math exact on the
    # un-padded region; padded rows/cols are sliced off at the end).
    if Mp != M or Hp != H:
        x2d = jnp.pad(x2d, ((0, Mp - M), (0, Hp - H)))
    w = weight
    b = bias
    if Hp != H:
        w = jnp.pad(weight, ((0, Hp - H), (0, Hp - H)))
        b = jnp.pad(bias, (0, Hp - H))
    b2d = b.reshape(1, Hp)

    # Explicit VMEM budget: double-buffered streaming tiles + resident scratch,
    # plus headroom. Well under the 64 MiB/TC ceiling on v7x for default tiles.
    itemsize = 4
    streamed = 2 * (tm * tk + tn * tk + tn + tm * tn + tm * tn)  # in + out, 2 bufs
    resident = tm * tn                                            # f32 accumulator
    vmem_limit = min(int(itemsize * (streamed + resident)) + (8 << 20), 100 << 20)

    grid = (Mp // tm, Hp // tn, Hp // tk)

    out2d = pl.pallas_call(
        _residual_to_plain_kernel,
        out_shape=jax.ShapeDtypeStruct((Mp, Hp), x.dtype),
        grid_spec=pltpu.PrefetchScalarGridSpec(
            num_scalar_prefetch=0,
            grid=grid,
            in_specs=[
                pl.BlockSpec((tm, tk), lambda i, j, k: (i, k)),  # x for matmul
                pl.BlockSpec((tn, tk), lambda i, j, k: (j, k)),  # weight panel
                pl.BlockSpec((1, tn), lambda i, j, k: (0, j)),   # bias slice
                pl.BlockSpec((tm, tn), lambda i, j, k: (i, j)),  # x for residual
            ],
            out_specs=pl.BlockSpec((tm, tn), lambda i, j, k: (i, j)),
            scratch_shapes=[pltpu.VMEM((tm, tn), jnp.float32)],
        ),
        compiler_params=pltpu.CompilerParams(
            dimension_semantics=("parallel", "parallel", "arbitrary"),
            vmem_limit_bytes=vmem_limit,
        ),
    )(x2d, w, b2d, x2d)

    return out2d[:M, :H].reshape(B, S, H)


if __name__ == "__main__":
    B, S, H = 2, 8, 32
    key = jax.random.PRNGKey(0)
    kx, kw, kb = jax.random.split(key, 3)

    x = jax.random.normal(kx, (B, S, H), dtype=jnp.float32)
    # Deterministic "Linear" parameters (PyTorch-style [out, in] weight).
    weight = jax.random.normal(kw, (H, H), dtype=jnp.float32) * (1.0 / jnp.sqrt(H))
    bias = jax.random.normal(kb, (H,), dtype=jnp.float32) * 0.1

    out = residual_to_plain(x, weight, bias)
    out = jax.block_until_ready(out)

    # Reference: Linear(x) - x in plain JAX.
    ref = jnp.einsum("bsh,oh->bso", x, weight) + bias - x
    assert out.shape == ref.shape
    assert jnp.allclose(out, ref, atol=1e-5, rtol=1e-5), "mismatch vs reference"

    print("KERNEL_OK")
</pallas_src>

<mosaic_0001>
module attributes {stable_mosaic.version = 11 : i64} {
  func.func @_residual_to_plain_kernel(%arg0: i32, %arg1: i32, %arg2: i32, %arg3: memref<16x128xf32, #tpu.memory_space<vmem>>, %arg4: memref<128x128xf32, #tpu.memory_space<vmem>>, %arg5: memref<1x128xf32, #tpu.memory_space<vmem>>, %arg6: memref<16x128xf32, #tpu.memory_space<vmem>>, %arg7: memref<16x128xf32, #tpu.memory_space<vmem>>, %arg8: memref<16x128xf32, #tpu.memory_space<vmem>>) attributes {dimension_semantics = [#tpu.dimension_semantics<parallel>, #tpu.dimension_semantics<parallel>, #tpu.dimension_semantics<arbitrary>], iteration_bounds = array<i64: 1, 1, 1>, scalar_prefetch = 0 : i64, scratch_operands = 1 : i64, tpu.core_type = #tpu.core_type<tc>, window_params = [{transform_indices = @transform_0, window_bounds = array<i64: 16, 128>}, {transform_indices = @transform_1, window_bounds = array<i64: 128, 128>}, {transform_indices = @transform_2, window_bounds = array<i64: 1, 128>}, {transform_indices = @transform_3, window_bounds = array<i64: 16, 128>}, {transform_indices = @transform_4, window_bounds = array<i64: 16, 128>}]} {
    %c0_i32 = arith.constant 0 : i32
    %0 = arith.cmpi eq, %arg2, %c0_i32 : i32
    %1 = arith.extui %0 : i1 to i32
    %c0_i32_0 = arith.constant 0 : i32
    %2 = arith.cmpi ne, %1, %c0_i32_0 : i32
    scf.if %2 {
      %cst_10 = arith.constant 0.000000e+00 : f32
      %12 = vector.broadcast %cst_10 : f32 to vector<16x128xf32>
      %c0_11 = arith.constant 0 : index
      %c0_12 = arith.constant 0 : index
      %13 = vector.load %arg8[%c0_11, %c0_12] : memref<16x128xf32, #tpu.memory_space<vmem>>, vector<16x128xf32>
      tpu.vector_store %arg8[%c0_11, %c0_12], %12 {strides = array<i32>} : memref<16x128xf32, #tpu.memory_space<vmem>>, vector<16x128xf32>,
    } else {
    }
    %c0 = arith.constant 0 : index
    %c0_1 = arith.constant 0 : index
    %3 = vector.load %arg8[%c0, %c0_1] : memref<16x128xf32, #tpu.memory_space<vmem>>, vector<16x128xf32>
    %c0_2 = arith.constant 0 : index
    %c0_3 = arith.constant 0 : index
    %4 = vector.load %arg3[%c0_2, %c0_3] : memref<16x128xf32, #tpu.memory_space<vmem>>, vector<16x128xf32>
    %c0_4 = arith.constant 0 : index
    %c0_5 = arith.constant 0 : index
    %5 = vector.load %arg4[%c0_4, %c0_5] : memref<128x128xf32, #tpu.memory_space<vmem>>, vector<128x128xf32>
    %cst = arith.constant dense<0.000000e+00> : vector<16x128xf32>
    %6 = tpu.matmul %4, %5, %cst {dimension_numbers = #tpu.dot_dimension_numbers<[1], [1], [0], [0], [0, 0, 1, 0], [], []>} : vector<16x128xf32>, vector<128x128xf32>, vector<16x128xf32> -> vector<16x128xf32>
    %7 = arith.addf %3, %6 : vector<16x128xf32>
    %c0_6 = arith.constant 0 : index
    %c0_7 = arith.constant 0 : index
    %8 = vector.load %arg8[%c0_6, %c0_7] : memref<16x128xf32, #tpu.memory_space<vmem>>, vector<16x128xf32>
    tpu.vector_store %arg8[%c0_6, %c0_7], %7 {strides = array<i32>} : memref<16x128xf32, #tpu.memory_space<vmem>>, vector<16x128xf32>,
    %c0_i32_8 = arith.constant 0 : i32
    %9 = arith.cmpi eq, %arg2, %c0_i32_8 : i32
    %10 = arith.extui %9 : i1 to i32
    %c0_i32_9 = arith.constant 0 : i32
    %11 = arith.cmpi ne, %10, %c0_i32_9 : i32
    scf.if %11 {
      %c0_10 = arith.constant 0 : index
      %c0_11 = arith.constant 0 : index
      %12 = vector.load %arg8[%c0_10, %c0_11] : memref<16x128xf32, #tpu.memory_space<vmem>>, vector<16x128xf32>
      %c0_12 = arith.constant 0 : index
      %c0_13 = arith.constant 0 : index
      %13 = vector.load %arg5[%c0_12, %c0_13] : memref<1x128xf32, #tpu.memory_space<vmem>>, vector<1x128xf32>
      %14 = vector.broadcast %13 : vector<1x128xf32> to vector<16x128xf32>
      %15 = arith.addf %12, %14 : vector<16x128xf32>
      %c0_14 = arith.constant 0 : index
      %c0_15 = arith.constant 0 : index
      %16 = vector.load %arg6[%c0_14, %c0_15] : memref<16x128xf32, #tpu.memory_space<vmem>>, vector<16x128xf32>
      %17 = arith.subf %15, %16 : vector<16x128xf32>
      %c0_16 = arith.constant 0 : index
      %c0_17 = arith.constant 0 : index
      %18 = vector.load %arg7[%c0_16, %c0_17] : memref<16x128xf32, #tpu.memory_space<vmem>>, vector<16x128xf32>
      tpu.vector_store %arg7[%c0_16, %c0_17], %17 {strides = array<i32>} : memref<16x128xf32, #tpu.memory_space<vmem>>, vector<16x128xf32>,
    } else {
    }
    return
  }
  func.func @transform_0(%arg0: i32, %arg1: i32, %arg2: i32) -> (i32, i32) {
    %c0_i32 = arith.constant 0 : i32
    return %arg0, %arg2 : i32, i32
  }
  func.func @transform_1(%arg0: i32, %arg1: i32, %arg2: i32) -> (i32, i32) {
    %c0_i32 = arith.constant 0 : i32
    return %arg1, %arg2 : i32, i32
  }
  func.func @transform_2(%arg0: i32, %arg1: i32, %arg2: i32) -> (i32, i32) {
    %c0_i32 = arith.constant 0 : i32
    %c0_i32_0 = arith.constant 0 : i32
    return %c0_i32, %arg1 : i32, i32
  }
  func.func @transform_3(%arg0: i32, %arg1: i32, %arg2: i32) -> (i32, i32) {
    %c0_i32 = arith.constant 0 : i32
    return %arg0, %arg1 : i32, i32
  }
  func.func @transform_4(%arg0: i32, %arg1: i32, %arg2: i32) -> (i32, i32) {
    %c0_i32 = arith.constant 0 : i32
    return %arg0, %arg1 : i32, i32
  }
}

</mosaic_0001>

<bundles_post_ra>
// kernel: residual_to_plain.1
= control target key start
LH: loop header
LB: loop body
LE: loop exit
PB: predicated region body
PF: predicated region fallthrough
CT: control target
= control target key end

     0   :  { %s326_s1 = inlined_call_operand.vmem [shape: f32[128,128], index: 1, kind: input, shape index: {}]   ;;  %s327_s0 = inlined_call_operand.vmem [shape: f32[16,128], index: 0, kind: input, shape index: {}, may-alias: {0,3}]   ;;  %s328_s2 = inlined_call_operand.vmem [shape: f32[1,128], index: 2, kind: input, shape index: {}]   ;;  %s329_s3 = inlined_call_operand.vmem [shape: f32[16,128], index: 3, kind: input, shape index: {}, may-alias: {0,3}]   ;;  %s330_s4 = inlined_call_operand.vmem [shape: f32[16,128], index: 4, kind: output, shape index: {}]  }
   0x1   :  { %v27_v0 = vld [vmem:[%s326_s1] sm:$0xff]  ;;  %v28_v1 = vld [vmem:[%s326_s1 + $0x8] sm:$0xff]  ;;  %v29_v2 = vld [vmem:[%s326_s1 + $0x10] sm:$0xff] }
   0x2   :  { %v200_v3 = vpack.c.bf16 %v28_v1, %v27_v0  ;;  %v30_v4 = vld [vmem:[%s326_s1 + $0x18] sm:$0xff]  ;;  %v25_v6 = vld [vmem:[%s327_s0] sm:$0xff]  ;;  %v32_v8 = vld [vmem:[%s326_s1 + $0x28] sm:$0xff] }
   0x3   :  { %v204_v5 = vpack.c.bf16 %v30_v4, %v29_v2  ;;  %v31_v7 = vld [vmem:[%s326_s1 + $0x20] sm:$0xff]  ;;  %197 = vmatprep.mubr.f32.mxu0 %v25_v6  ;;  %v33_v10 = vld [vmem:[%s326_s1 + $0x30] sm:$0xff]  ;;  %v34_v11 = vld [vmem:[%s326_s1 + $0x38] sm:$0xff] }
   0x4   :  { %201 = vmatprep.subr.bf16.mxu0 %v200_v3  ;;  %v208_v9 = vpack.c.bf16 %v32_v8, %v31_v7  ;;  %v212_v12 = vpack.c.bf16 %v34_v11, %v33_v10  ;;  %v35_v13 = vld [vmem:[%s326_s1 + $0x40] sm:$0xff]  ;;  %v36_v14 = vld [vmem:[%s326_s1 + $0x48] sm:$0xff]  ;;  %v37_v16 = vld [vmem:[%s326_s1 + $0x50] sm:$0xff] }
   0x5   :  { %203 = vmatpush3.bf16.xpose.msra.mxu0 %v200_v3  ;;  %v216_v15 = vpack.c.bf16 %v36_v14, %v35_v13  ;;  %v38_v17 = vld [vmem:[%s326_s1 + $0x58] sm:$0xff]  ;;  %v39_v19 = vld [vmem:[%s326_s1 + $0x60] sm:$0xff]  ;;  %v40_v20 = vld [vmem:[%s326_s1 + $0x68] sm:$0xff] }
   0x6   :  { %205 = vmatprep.subr.bf16.mxu0 %v204_v5  ;;  %v220_v18 = vpack.c.bf16 %v38_v17, %v37_v16  ;;  %v224_v21 = vpack.c.bf16 %v40_v20, %v39_v19  ;;  %v41_v22 = vld [vmem:[%s326_s1 + $0x70] sm:$0xff]  ;;  %v42_v23 = vld [vmem:[%s326_s1 + $0x78] sm:$0xff]  ;;  %v26_v25 = vld [vmem:[%s327_s0 + $0x8] sm:$0xff] }
   0x7   :  { %v228_v24 = vpack.c.bf16 %v42_v23, %v41_v22  ;;  %v146_v26 = vld [vmem:[%s328_s2] ss:$0 sm:$0xff]  ;;  %v137_v28 = vld [vmem:[%s329_s3 + $0x8] sm:$0xff] }
   0x8   :  { %v136_v31 = vld [vmem:[%s329_s3] sm:$0xff] }
   0xd   :  { %207 = vmatpush3.bf16.xpose.msra.mxu0 %v204_v5 }
   0xe   :  { %209 = vmatprep.subr.bf16.mxu0 %v208_v9 }
  0x15   :  { %211 = vmatpush3.bf16.xpose.msra.mxu0 %v208_v9 }
  0x16   :  { %213 = vmatprep.subr.bf16.mxu0 %v212_v12 }
  0x1d   :  { %215 = vmatpush3.bf16.xpose.msra.mxu0 %v212_v12 }
  0x1e   :  { %217 = vmatprep.subr.bf16.mxu0 %v216_v15 }
  0x25   :  { %219 = vmatpush3.bf16.xpose.msra.mxu0 %v216_v15 }
  0x26   :  { %221 = vmatprep.subr.bf16.mxu0 %v220_v18 }
  0x2d   :  { %223 = vmatpush3.bf16.xpose.msra.mxu0 %v220_v18 }
  0x2e   :  { %225 = vmatprep.subr.bf16.mxu0 %v224_v21 }
  0x35   :  { %227 = vmatpush3.bf16.xpose.msra.mxu0 %v224_v21 }
  0x36   :  { %229 = vmatprep.subr.bf16.mxu0 %v228_v24 }
  0x3d   :  { %231 = vmatpush3.bf16.xpose.msra.mxu0 %v228_v24 }
  0x44   :  { %198 = vmatmul.mubr.f32.vlgmr.msra.gmra.mrb[0].mxu0 %v26_v25 }
 0x117   :  { %v199_v27 = vpop.f32.mrb[0].mxu0 }
 0x118   :  { %v135_v29 = vadd.f32 %v199_v27, %v146_v26  ;;  %v109_v30 = vpop.f32.mrb[1].mxu0 }
 0x119   :  { %v134_v32 = vadd.f32 %v146_v26, %v109_v30 }
 0x11a   :  { %v139_v33 = vsub.f32 %v135_v29, %v137_v28 }
 0x11b   :  { %v138_v34 = vsub.f32 %v134_v32, %v136_v31 }
 0x11c   :  { %141 = vst [vmem:[%s330_s4 + $0x8] sm:$0xff] %v139_v33 }
 0x11d   :  { %140 = vst [vmem:[%s330_s4] sm:$0xff] %v138_v34 }

</bundles_post_ra>
